<compile_context>
chip_gen: v7x
topology: tpu7x:2x2x1
jax: 0.10.0
libtpu: 0.0.40
codegen_flags: <defaults>
</compile_context>

<pallas_src>
import jax
import jax.numpy as jnp
from jax.experimental import pallas as pl
from jax.experimental.pallas import tpu as pltpu

EPS = 1e-5


# ----------------------------------------------------------------------------
# Sizing helpers (per-generation VMEM / tile selection)
# ----------------------------------------------------------------------------
def _tpu_vmem_bytes():
    try:
        return int(pltpu.get_tpu_info().vmem_capacity_bytes)
    except Exception:
        return 64 * 1024 * 1024   # conservative (v7x-sized) fallback


def _pick_row_tile(m, target, mult=16):
    """Largest row tile <= target that divides m and is a multiple of `mult`
    (falls back to m itself, which is always a legal full-extent block)."""
    if m <= target:
        return m
    t = (min(target, m) // mult) * mult
    while t >= mult:
        if m % t == 0:
            return t
        t -= mult
    return m


def _split_steps(num_steps):
    """Split a 1-D step count into (parallel, arbitrary) factors for megacore."""
    if num_steps >= 2 and num_steps % 2 == 0:
        return 2, num_steps // 2
    return 1, num_steps


def _finalize_bn(s_parts, q_parts, gamma, beta, count):
    """Tiny finalize of the in-kernel sum / sum-of-squares partials.

    s_parts, q_parts: (n_par, 1, C) partial reductions (f32).
    """
    s = jnp.sum(s_parts, axis=0)                     # (1, C)
    q = jnp.sum(q_parts, axis=0)
    mean = s / count
    var = jnp.maximum(q / count - mean * mean, 0.0)  # clamp one-pass variance
    scale = gamma * jax.lax.rsqrt(var + EPS)
    shift = beta - mean * scale
    return scale, shift


# ----------------------------------------------------------------------------
# Kernels
# ----------------------------------------------------------------------------
def _make_conv1x1_kernel(pre_act):
    """1x1 conv (+ optional preceding BN-affine + ReLU) + batch-stat partials.

    Grid is (parallel, arbitrary).  The (1, 1, C) stats outputs are indexed
    only by the parallel axis, so they stay resident in VMEM across the
    arbitrary (row-tile) axis and act as the phase-1 accumulator of the
    two-phase BN reduction; each parallel chunk produces its own partial.
    """
    def body(x_f32, w_ref, h_ref, sum_ref, sq_ref):
        h = jnp.dot(x_f32.astype(jnp.bfloat16), w_ref[...],
                    preferred_element_type=jnp.float32)
        h_ref[...] = h.astype(h_ref.dtype)

        @pl.when(pl.program_id(1) == 0)
        def _():
            sum_ref[...] = jnp.zeros_like(sum_ref)
            sq_ref[...] = jnp.zeros_like(sq_ref)

        sum_ref[...] += jnp.sum(h, axis=0, keepdims=True)[None]
        sq_ref[...] += jnp.sum(h * h, axis=0, keepdims=True)[None]

    if pre_act:
        def kernel(x_ref, scale_ref, shift_ref, w_ref, h_ref, sum_ref, sq_ref):
            x = jnp.maximum(
                x_ref[...].astype(jnp.float32) * scale_ref[...] + shift_ref[...],
                0.0)
            body(x, w_ref, h_ref, sum_ref, sq_ref)
    else:
        def kernel(x_ref, w_ref, h_ref, sum_ref, sq_ref):
            body(x_ref[...].astype(jnp.float32), w_ref, h_ref, sum_ref, sq_ref)
    return kernel


def _make_conv3x3_kernel(H, W, width, fused):
    """BN-affine + ReLU + 3x3 conv (pad=1, stride=1) on whole images per grid
    step + batch-stat partials.

    `fused`  : one im2col matmul with K=9*width (width a multiple of 128).
    `!fused` : 9 accumulating matmuls into an f32 acc (narrow widths), no
               lane-axis concatenation, no 9x patch temporary.
    Shifted taps use pltpu.roll (XLU rotate); the boundary-validity mask
    already zeroes the rows that wrap.
    """
    taps = [(oy, ox) for oy in (-1, 0, 1) for ox in (-1, 0, 1)]

    def kernel(a_ref, scale_ref, shift_ref, w_ref, h_ref, sum_ref, sq_ref):
        rows = a_ref.shape[0]
        a = jnp.maximum(
            a_ref[...].astype(jnp.float32) * scale_ref[...] + shift_ref[...],
            0.0)

        m = jax.lax.broadcasted_iota(jnp.int32, (rows, 1), 0)
        yy = (m // W) % H
        xx = m % W

        def tap(oy, ox):
            s = oy * W + ox                       # want out[r] = a[r + s]
            k = (-s) % rows                       # roll amount (non-negative)
            shifted = a if k == 0 else pltpu.roll(a, shift=k, axis=0)
            valid = ((yy + oy >= 0) & (yy + oy < H) &
                     (xx + ox >= 0) & (xx + ox < W))
            return jnp.where(valid, shifted, 0.0).astype(jnp.bfloat16)

        if fused:
            patches = jnp.concatenate([tap(oy, ox) for oy, ox in taps], axis=1)
            h = jnp.dot(patches, w_ref[...], preferred_element_type=jnp.float32)
        else:
            h = jnp.zeros((rows, width), jnp.float32)
            for t, (oy, ox) in enumerate(taps):
                h = h + jnp.dot(tap(oy, ox), w_ref[t],
                                preferred_element_type=jnp.float32)

        h_ref[...] = h.astype(h_ref.dtype)

        @pl.when(pl.program_id(1) == 0)
        def _():
            sum_ref[...] = jnp.zeros_like(sum_ref)
            sq_ref[...] = jnp.zeros_like(sq_ref)

        sum_ref[...] += jnp.sum(h, axis=0, keepdims=True)[None]
        sq_ref[...] += jnp.sum(h * h, axis=0, keepdims=True)[None]

    return kernel


def _bn_add_relu_kernel(h_ref, x_ref, scale_ref, shift_ref, o_ref):
    """Final bn3 + residual add + ReLU on a lane-dense folded view (f32 math)."""
    o_ref[...] = jnp.maximum(
        h_ref[...].astype(jnp.float32) * scale_ref[...] + shift_ref[...]
        + x_ref[...], 0.0)


# ----------------------------------------------------------------------------
# Wrapper
# ----------------------------------------------------------------------------
def bottleneck_forward(x, w1, w2, w3, g1, b1, g2, b2, g3, b3, *, row_tile=None):
    """x: NHWC [N,H,W,Cin]; w1: (Cin,width); w2: (9,width,width) (3x3 taps,
    HWIO order flattened over dy*3+dx); w3: (width,Cout). Returns NHWC f32."""
    N, H, W, Cin = x.shape
    width = w1.shape[1]
    Cout = w3.shape[1]
    assert Cin == Cout, "downsample=None requires Cin == planes * expansion"
    M = N * H * W
    x2d = x.reshape(M, Cin)

    # Per-generation VMEM budget / row tile.
    vmem_cap = _tpu_vmem_bytes()
    vmem_budget = min(int(vmem_cap * 0.75), 112 * 1024 * 1024)
    if row_tile is None:
        row_tile = 1024 if vmem_cap >= 96 * 1024 * 1024 else 512

    cp_conv = pltpu.CompilerParams(
        dimension_semantics=("parallel", "arbitrary"),
        vmem_limit_bytes=vmem_budget)
    cp_eltw = pltpu.CompilerParams(
        dimension_semantics=("parallel",),
        vmem_limit_bytes=vmem_budget)

    # Weights pre-cast to bf16 once (resident blocks stay bf16 in VMEM).
    w1b = w1.astype(jnp.bfloat16)
    w3b = w3.astype(jnp.bfloat16)
    fused3x3 = (width % 128 == 0)
    w2b = (w2.reshape(9 * width, width) if fused3x3 else w2).astype(jnp.bfloat16)

    def row_map(steps):
        return lambda p, i: (p * steps + i, 0)

    stat_map = lambda p, i: (p, 0, 0)

    # ---- stage 1: conv1 (1x1) + bn1 statistics ------------------------------
    rt1 = _pick_row_tile(M, row_tile, 16)
    npar1, steps1 = _split_steps(M // rt1)
    h1, s1, q1 = pl.pallas_call(
        _make_conv1x1_kernel(pre_act=False),
        grid=(npar1, steps1),
        in_specs=[
            pl.BlockSpec((rt1, Cin), row_map(steps1)),
            pl.BlockSpec((Cin, width), lambda p, i: (0, 0)),
        ],
        out_specs=[
            pl.BlockSpec((rt1, width), row_map(steps1)),
            pl.BlockSpec((1, 1, width), stat_map),
            pl.BlockSpec((1, 1, width), stat_map),
        ],
        out_shape=[
            jax.ShapeDtypeStruct((M, width), jnp.bfloat16),
            jax.ShapeDtypeStruct((npar1, 1, width), jnp.float32),
            jax.ShapeDtypeStruct((npar1, 1, width), jnp.float32),
        ],
        compiler_params=cp_conv,
    )(x2d, w1b)
    scale1, shift1 = _finalize_bn(s1, q1, g1, b1, M)

    # ---- stage 2: bn1 + relu -> conv2 (3x3, pad=1) + bn2 statistics ---------
    hw = H * W
    g_img = next((c for c in range(1, N + 1)
                  if N % c == 0 and (c * hw) % 8 == 0), N)
    rows2 = g_img * hw                       # whole images per grid step
    npar2, steps2 = _split_steps(M // rows2)
    h2, s2, q2 = pl.pallas_call(
        _make_conv3x3_kernel(H, W, width, fused3x3),
        grid=(npar2, steps2),
        in_specs=[
            pl.BlockSpec((rows2, width), row_map(steps2)),
            pl.BlockSpec((1, width), lambda p, i: (0, 0)),
            pl.BlockSpec((1, width), lambda p, i: (0, 0)),
            pl.BlockSpec(w2b.shape, lambda p, i: (0,) * w2b.ndim),
        ],
        out_specs=[
            pl.BlockSpec((rows2, width), row_map(steps2)),
            pl.BlockSpec((1, 1, width), stat_map),
            pl.BlockSpec((1, 1, width), stat_map),
        ],
        out_shape=[
            jax.ShapeDtypeStruct((M, width), jnp.bfloat16),
            jax.ShapeDtypeStruct((npar2, 1, width), jnp.float32),
            jax.ShapeDtypeStruct((npar2, 1, width), jnp.float32),
        ],
        compiler_params=cp_conv,
    )(h1, scale1, shift1, w2b)
    scale2, shift2 = _finalize_bn(s2, q2, g2, b2, M)

    # ---- stage 3: bn2 + relu -> conv3 (1x1) + bn3 statistics ----------------
    rt3 = _pick_row_tile(M, row_tile, 16)
    npar3, steps3 = _split_steps(M // rt3)
    h3, s3, q3 = pl.pallas_call(
        _make_conv1x1_kernel(pre_act=True),
        grid=(npar3, steps3),
        in_specs=[
            pl.BlockSpec((rt3, width), row_map(steps3)),
            pl.BlockSpec((1, width), lambda p, i: (0, 0)),
            pl.BlockSpec((1, width), lambda p, i: (0, 0)),
            pl.BlockSpec((width, Cout), lambda p, i: (0, 0)),
        ],
        out_specs=[
            pl.BlockSpec((rt3, Cout), row_map(steps3)),
            pl.BlockSpec((1, 1, Cout), stat_map),
            pl.BlockSpec((1, 1, Cout), stat_map),
        ],
        out_shape=[
            jax.ShapeDtypeStruct((M, Cout), jnp.bfloat16),
            jax.ShapeDtypeStruct((npar3, 1, Cout), jnp.float32),
            jax.ShapeDtypeStruct((npar3, 1, Cout), jnp.float32),
        ],
        compiler_params=cp_conv,
    )(h2, scale2, shift2, w3b)
    scale3, shift3 = _finalize_bn(s3, q3, g3, b3, M)

    # ---- stage 4: bn3 + residual + relu (lane-dense folded layout) ----------
    fold = 1
    if Cout < 128 and 128 % Cout == 0 and M % (128 // Cout) == 0:
        fold = 128 // Cout
    mf = M // fold
    lanes = Cout * fold
    rtf = _pick_row_tile(mf, row_tile, 8)

    out = pl.pallas_call(
        _bn_add_relu_kernel,
        grid=(mf // rtf,),
        in_specs=[
            pl.BlockSpec((rtf, lanes), lambda i: (i, 0)),
            pl.BlockSpec((rtf, lanes), lambda i: (i, 0)),
            pl.BlockSpec((1, lanes), lambda i: (0, 0)),
            pl.BlockSpec((1, lanes), lambda i: (0, 0)),
        ],
        out_specs=pl.BlockSpec((rtf, lanes), lambda i: (i, 0)),
        out_shape=jax.ShapeDtypeStruct((mf, lanes), jnp.float32),
        compiler_params=cp_eltw,
    )(h3.reshape(mf, lanes), x2d.reshape(mf, lanes),
      jnp.tile(scale3, (1, fold)), jnp.tile(shift3, (1, fold)))

    return out.reshape(N, H, W, Cout)


# ----------------------------------------------------------------------------
# Pure-JAX reference (same forward pass, NHWC, f32)
# ----------------------------------------------------------------------------
def reference(x, w1, w2, w3, g1, b1, g2, b2, g3, b3):
    def bn(h, g, b):
        mean = jnp.mean(h, axis=(0, 1, 2), keepdims=True)
        var = jnp.mean((h - mean) ** 2, axis=(0, 1, 2), keepdims=True)
        return (h - mean) / jnp.sqrt(var + EPS) * g.reshape(1, 1, 1, -1) \
            + b.reshape(1, 1, 1, -1)

    dn = ("NHWC", "HWIO", "NHWC")
    Cin = x.shape[-1]
    width = w1.shape[1]
    h = jax.lax.conv_general_dilated(x, w1.reshape(1, 1, Cin, width),
                                     (1, 1), "VALID", dimension_numbers=dn)
    h = jnp.maximum(bn(h, g1, b1), 0.0)
    h = jax.lax.conv_general_dilated(h, w2.reshape(3, 3, width, width),
                                     (1, 1), ((1, 1), (1, 1)),
                                     dimension_numbers=dn)
    h = jnp.maximum(bn(h, g2, b2), 0.0)
    h = jax.lax.conv_general_dilated(h, w3.reshape(1, 1, width, -1),
                                     (1, 1), "VALID", dimension_numbers=dn)
    h = bn(h, g3, b3)
    return jnp.maximum(h + x, 0.0)


if __name__ == "__main__":
    # Bottleneck(inplanes=16, planes=4): width=4, out_channels=16, so the
    # identity add is valid with downsample=None, stride=1.
    N, H, W = 2, 8, 8
    inplanes, planes = 16, 4
    width = planes           # base_width=64, groups=1
    cout = planes * 4        # expansion

    key = jax.random.PRNGKey(0)
    k = jax.random.split(key, 8)

    x = jax.random.normal(k[0], (N, H, W, inplanes), jnp.float32)

    # 1x1 weights: (C_in, C_out); 3x3 weights: (9, C_in, C_out) (HWIO taps).
    w1 = jax.random.normal(k[1], (inplanes, width), jnp.float32) * 0.1
    w2 = jax.random.normal(k[2], (9, width, width), jnp.float32) * 0.1
    w3 = jax.random.normal(k[3], (width, cout), jnp.float32) * 0.1

    g1 = 1.0 + 0.1 * jax.random.normal(k[4], (1, width), jnp.float32)
    b1 = 0.1 * jax.random.normal(k[5], (1, width), jnp.float32)
    g2 = 1.0 + 0.1 * jax.random.normal(k[6], (1, width), jnp.float32)
    b2 = 0.1 * jax.random.normal(k[7], (1, width), jnp.float32)
    g3 = jnp.full((1, cout), 1.05, jnp.float32)
    b3 = jnp.full((1, cout), -0.02, jnp.float32)

    # row_tile=32 -> (parallel=2, arbitrary=2) grids for the 1x1 stages at
    # this demo size, exercising the megacore split + partial-stat reduction.
    out = bottleneck_forward(x, w1, w2, w3, g1, b1, g2, b2, g3, b3,
                             row_tile=32)
    out = jax.block_until_ready(out)

    ref = reference(x, w1, w2, w3, g1, b1, g2, b2, g3, b3)
    assert out.shape == (N, H, W, cout)
    err = float(jnp.max(jnp.abs(out - ref)))
    # Tolerance accounts for bf16 MXU operands AND bf16-stored intermediate
    # activations (f32 accumulation / statistics / residual).
    assert jnp.allclose(out, ref, atol=5e-2, rtol=5e-2), \
        f"max abs diff = {err}"

    print("KERNEL_OK")
</pallas_src>

<mosaic_0001>
module attributes {stable_mosaic.version = 11 : i64} {
  func.func @kernel(%arg0: i32, %arg1: i32, %arg2: memref<32x16xf32, #tpu.memory_space<vmem>>, %arg3: memref<16x4xbf16, #tpu.memory_space<vmem>>, %arg4: memref<32x4xbf16, #tpu.memory_space<vmem>>, %arg5: memref<1x1x4xf32, #tpu.memory_space<vmem>>, %arg6: memref<1x1x4xf32, #tpu.memory_space<vmem>>) attributes {dimension_semantics = [#tpu.dimension_semantics<parallel>, #tpu.dimension_semantics<arbitrary>], iteration_bounds = array<i64: 2, 2>, scalar_prefetch = 0 : i64, scratch_operands = 0 : i64, tpu.core_type = #tpu.core_type<tc>, window_params = [{transform_indices = @transform_0, window_bounds = array<i64: 32, 16>}, {pipeline_mode = #tpu.pipeline_mode<synchronous>, transform_indices = @transform_1, window_bounds = array<i64: 16, 4>}, {transform_indices = @transform_2, window_bounds = array<i64: 32, 4>}, {transform_indices = @transform_3, window_bounds = array<i64: 1, 1, 4>}, {transform_indices = @transform_4, window_bounds = array<i64: 1, 1, 4>}]} {
    %c0 = arith.constant 0 : index
    %c0_0 = arith.constant 0 : index
    %0 = vector.load %arg2[%c0, %c0_0] : memref<32x16xf32, #tpu.memory_space<vmem>>, vector<32x16xf32>
    %1 = arith.truncf %0 : vector<32x16xf32> to vector<32x16xbf16>
    %c0_1 = arith.constant 0 : index
    %c0_2 = arith.constant 0 : index
    %2 = vector.load %arg3[%c0_1, %c0_2] : memref<16x4xbf16, #tpu.memory_space<vmem>>, vector<16x4xbf16>
    %cst = arith.constant dense<0.000000e+00> : vector<32x4xf32>
    %3 = tpu.matmul %1, %2, %cst {dimension_numbers = #tpu.dot_dimension_numbers<[1], [0], [0], [1], [0, 0, 1, 1], [], []>} : vector<32x16xbf16>, vector<16x4xbf16>, vector<32x4xf32> -> vector<32x4xf32>
    %4 = arith.truncf %3 : vector<32x4xf32> to vector<32x4xbf16>
    %c0_3 = arith.constant 0 : index
    %c0_4 = arith.constant 0 : index
    %5 = vector.load %arg4[%c0_3, %c0_4] : memref<32x4xbf16, #tpu.memory_space<vmem>>, vector<32x4xbf16>
    tpu.vector_store %arg4[%c0_3, %c0_4], %4 {strides = array<i32>} : memref<32x4xbf16, #tpu.memory_space<vmem>>, vector<32x4xbf16>,
    %c0_i32 = arith.constant 0 : i32
    %6 = arith.cmpi eq, %arg1, %c0_i32 : i32
    %7 = arith.extui %6 : i1 to i32
    %c0_i32_5 = arith.constant 0 : i32
    %8 = arith.cmpi ne, %7, %c0_i32_5 : i32
    scf.if %8 {
      %cst_20 = arith.constant 0.000000e+00 : f32
      %22 = vector.broadcast %cst_20 : f32 to vector<1x1x4xf32>
      %c0_21 = arith.constant 0 : index
      %c0_22 = arith.constant 0 : index
      %c0_23 = arith.constant 0 : index
      %23 = vector.load %arg5[%c0_21, %c0_22, %c0_23] : memref<1x1x4xf32, #tpu.memory_space<vmem>>, vector<1x1x4xf32>
      tpu.vector_store %arg5[%c0_21, %c0_22, %c0_23], %22 {strides = array<i32>} : memref<1x1x4xf32, #tpu.memory_space<vmem>>, vector<1x1x4xf32>,
      %cst_24 = arith.constant 0.000000e+00 : f32
      %24 = vector.broadcast %cst_24 : f32 to vector<1x1x4xf32>
      %c0_25 = arith.constant 0 : index
      %c0_26 = arith.constant 0 : index
      %c0_27 = arith.constant 0 : index
      %25 = vector.load %arg6[%c0_25, %c0_26, %c0_27] : memref<1x1x4xf32, #tpu.memory_space<vmem>>, vector<1x1x4xf32>
      tpu.vector_store %arg6[%c0_25, %c0_26, %c0_27], %24 {strides = array<i32>} : memref<1x1x4xf32, #tpu.memory_space<vmem>>, vector<1x1x4xf32>,
    } else {
    }
    %c0_6 = arith.constant 0 : index
    %c0_7 = arith.constant 0 : index
    %c0_8 = arith.constant 0 : index
    %9 = vector.load %arg5[%c0_6, %c0_7, %c0_8] : memref<1x1x4xf32, #tpu.memory_space<vmem>>, vector<1x1x4xf32>
    %cst_9 = arith.constant dense<0.000000e+00> : vector<4xf32>
    %10 = vector.multi_reduction <add>, %3, %cst_9 [0] : vector<32x4xf32> to vector<4xf32>
    %11 = vector.shape_cast %10 : vector<4xf32> to vector<1x4xf32>
    %12 = vector.shape_cast %11 : vector<1x4xf32> to vector<1x1x4xf32>
    %13 = arith.addf %9, %12 : vector<1x1x4xf32>
    %c0_10 = arith.constant 0 : index
    %c0_11 = arith.constant 0 : index
    %c0_12 = arith.constant 0 : index
    %14 = vector.load %arg5[%c0_10, %c0_11, %c0_12] : memref<1x1x4xf32, #tpu.memory_space<vmem>>, vector<1x1x4xf32>
    tpu.vector_store %arg5[%c0_10, %c0_11, %c0_12], %13 {strides = array<i32>} : memref<1x1x4xf32, #tpu.memory_space<vmem>>, vector<1x1x4xf32>,
    %c0_13 = arith.constant 0 : index
    %c0_14 = arith.constant 0 : index
    %c0_15 = arith.constant 0 : index
    %15 = vector.load %arg6[%c0_13, %c0_14, %c0_15] : memref<1x1x4xf32, #tpu.memory_space<vmem>>, vector<1x1x4xf32>
    %16 = arith.mulf %3, %3 : vector<32x4xf32>
    %cst_16 = arith.constant dense<0.000000e+00> : vector<4xf32>
    %17 = vector.multi_reduction <add>, %16, %cst_16 [0] : vector<32x4xf32> to vector<4xf32>
    %18 = vector.shape_cast %17 : vector<4xf32> to vector<1x4xf32>
    %19 = vector.shape_cast %18 : vector<1x4xf32> to vector<1x1x4xf32>
    %20 = arith.addf %15, %19 : vector<1x1x4xf32>
    %c0_17 = arith.constant 0 : index
    %c0_18 = arith.constant 0 : index
    %c0_19 = arith.constant 0 : index
    %21 = vector.load %arg6[%c0_17, %c0_18, %c0_19] : memref<1x1x4xf32, #tpu.memory_space<vmem>>, vector<1x1x4xf32>
    tpu.vector_store %arg6[%c0_17, %c0_18, %c0_19], %20 {strides = array<i32>} : memref<1x1x4xf32, #tpu.memory_space<vmem>>, vector<1x1x4xf32>,
    return
  }
  func.func @transform_0(%arg0: i32, %arg1: i32) -> (i32, i32) {
    %c2_i32 = arith.constant 2 : i32
    %0 = arith.muli %arg0, %c2_i32 : i32
    %1 = arith.addi %0, %arg1 : i32
    %c0_i32 = arith.constant 0 : i32
    %c0_i32_0 = arith.constant 0 : i32
    return %1, %c0_i32 : i32, i32
  }
  func.func @transform_1(%arg0: i32, %arg1: i32) -> (i32, i32) {
    %c0_i32 = arith.constant 0 : i32
    %c0_i32_0 = arith.constant 0 : i32
    %c0_i32_1 = arith.constant 0 : i32
    return %c0_i32, %c0_i32_0 : i32, i32
  }
  func.func @transform_2(%arg0: i32, %arg1: i32) -> (i32, i32) {
    %c2_i32 = arith.constant 2 : i32
    %0 = arith.muli %arg0, %c2_i32 : i32
    %1 = arith.addi %0, %arg1 : i32
    %c0_i32 = arith.constant 0 : i32
    %c0_i32_0 = arith.constant 0 : i32
    return %1, %c0_i32 : i32, i32
  }
  func.func @transform_3(%arg0: i32, %arg1: i32) -> (i32, i32, i32) {
    %c0_i32 = arith.constant 0 : i32
    %c0_i32_0 = arith.constant 0 : i32
    %c0_i32_1 = arith.constant 0 : i32
    return %arg0, %c0_i32, %c0_i32_0 : i32, i32, i32
  }
  func.func @transform_4(%arg0: i32, %arg1: i32) -> (i32, i32, i32) {
    %c0_i32 = arith.constant 0 : i32
    %c0_i32_0 = arith.constant 0 : i32
    %c0_i32_1 = arith.constant 0 : i32
    return %arg0, %c0_i32, %c0_i32_0 : i32, i32, i32
  }
}

</mosaic_0001>

<bundles_post_ra>
// kernel: tpu_custom_call.1
= control target key start
LH: loop header
LB: loop body
LE: loop exit
PB: predicated region body
PF: predicated region fallthrough
CT: control target
= control target key end

     0   :  { %10 = vsyncpa [#allocation3], 0  ;;  %s1018_s0 = inlined_call_operand.vmem [shape: f32[128,16], index: 0, kind: input, shape index: {}]   ;;  %s1019_s1 = inlined_call_operand.vmem [shape: bf16[16,4], index: 1, kind: input, shape index: {}]   ;;  %s1020_s2 = inlined_call_operand.vmem [shape: bf16[128,4], index: 2, kind: output, shape index: {0}]   ;;  %s1021_s3 = inlined_call_operand.hbm [shape: f32[2,1,4], index: 3, kind: output, shape index: {1}]   ;;  %s1022_s4 = inlined_call_operand.hbm [shape: f32[2,1,4], index: 4, kind: output, shape index: {2}]  }
   0x1   :  { %12 = vsyncpa [#allocation3 + $0x1], 0 }
   0x2   :  { %13 = vsyncpa [#allocation5], 0 }
   0x3   :  { %15 = vsyncpa [#allocation5 + $0x1], 0  ;;  %s831_s15 = smov 0   ;;  %s833_s16 = smov 0  }
   0x4   :  { %s835_s17 = smov 0   ;;  %s837_s18 = smov 0  }
   0x5   :  { %s839_s19 = smov 0   ;;  %s841_s20 = smov 0  }
   0x6   :  { %s843_s21 = smov 0   ;;  %s845_s22 = smov 0  }
   0x7 LB: > { %s557_s23 = sadd.s32 4294967295, %s801_s22   ;;  %s558_s24 = sadd.s32 4294967294, %s801_s22   ;;  %s801_s22 = sphi %s845_s22, %s21_s22   ;;  %s797_s21 = sphi %s843_s21, %s1031_s21   ;;  %s793_s20 = sphi %s841_s20, %s1030_s20   ;;  %s789_s19 = sphi %s839_s19, %s1029_s19   ;;  %s785_s18 = sphi %s837_s18, %s1028_s18   ;;  %s781_s17 = sphi %s835_s17, %s1027_s17   ;;  %s777_s16 = sphi %s833_s16, %s1026_s16   ;;  %s773_s15 = sphi %s831_s15, %s1025_s15  }
   0x8   : > { %s30_s25 = sadd.s32 1, %s793_s20  ;;  %s33_s26 = sadd.s32 1, %s797_s21 }
   0x9   : > { %p31_p0 = scmp.ge.s32.totalorder %s30_s25, 2  ;;  %p131_p1 = scmp.ne.s32.totalorder %s781_s17, %s777_s16 }
   0xa   : > { %p132_p2 = scmp.eq.s32.totalorder %s557_s23, 3  ;;  %p137_p4 = scmp.ne.s32.totalorder %s777_s16, %s773_s15 }
   0xb   : > { %s1033_s25 = smov (%p31_p0, %s30_s25), 0  ;;  %s1035_s26 = smov (!%p31_p0, %s33_s26), %s797_s21 }
   0xc   : > { %p880_p3 = por %p132_p2, %p131_p1  ;;  %p35_p5 = scmp.ge.s32.totalorder %s1035_s26, 2 }
   0xd   : > { %p138_p6 = scmp.eq.s32.totalorder %s558_s24, 3  ;;  %p565_p7 = scmp.ge.s32.totalorder %s801_s22, 1 }
   0xe   : > { %p198_p8 = scmp.lt.s32.totalorder %s801_s22, 5  ;;  %s1037_s26 = smov (%p35_p5, %s1035_s26), 0 }
   0xf   : > { %p890_p9 = por %p138_p6, %p137_p4  ;;  %s118_s29 = ssub.s32 %s797_s21, %s1037_s26 }
  0x10   : > { %p199_p10 = pnand %p565_p7, %p198_p8  ;;  %s121_s30 = sadd.s32 1, %s781_s17 }
  0x11   : > { %p119_p11 = scmp.eq.s32.totalorder %s118_s29, 0  ;;  %s901_s6 = sand.u32 (!%p199_p10), 1, %s777_s16   ;;  %v674_v0 = vld [vmem:[%s1019_s1] sm:$0xff] (!%p199_p10)   ;;  %vm271_vm0 = vcmask (!%p199_p10), 130048   ;;  %vm343_vm1 = vcmask (!%p199_p10), 27648  }
  0x12   : > { %202 = sbr.rel (%p199_p10) target bundleno = 309 (0x135), region = 28  ;;  %591 = vmatprep.subr.bf16.mxu0 (!%p199_p10), %v674_v0  ;;  %s566_s9 = sshll.u32 (!%p199_p10), %s789_s19, 1 }
  0x13   : > { %s898_s5 = scalar_select %p119_p11, %s781_s17, %s121_s30  }
  0x14   : > { %592 = vmatpush3.bf16.msra.mxu0 (!%p199_p10), %v674_v0  ;;  %s237_s10 = sadd.s32 (!%p199_p10), %s785_s18, %s566_s9  ;;  %s915_s8 = scalar_lea.vmem (!%p199_p10), [#allocation2], %s901_s6 }
  0x15   : > { %s567_s11 = sshll.u32 (!%p199_p10), %s237_s10, 2  ;;  %s918_s9 = scalar_lea.vmem (!%p199_p10), [#allocation4], %s901_s6 }
  0x16   : > { %p239_p12 = scmp.lt.s32.totalorder (!%p199_p10), %s567_s11, 15  ;;  %p579_p13 = scmp.ne.s32.totalorder (!%p199_p10), %s785_s18, 0 }
  0x19   : > { %s1039_s11 = smov (!%p239_p12, %s567_s11), 15  ;;  %vm352_vm2 = vcmask (!%p579_p13), 24576   ;;  %v803_v15 = vmov (!%p579_p13), 0.0  }
  0x1a   : > { %s568_s12 = sshll.u32 %s1039_s11, 3  ;;  %s571_s24 = sshll.u32 %s1039_s11, 2  ;;  %353 = vst.msk [vmem:[%s915_s8] sm:$0x1] (!%p579_p13), %vm352_vm2, %v803_v15  ;;  %354 = vst.msk [vmem:[%s918_s9] sm:$0x1] (!%p579_p13), %vm352_vm2, %v803_v15 }
  0x1b   : > { %s242_s23 = scalar_lea.vmem %s1018_s0, %s568_s12  ;;  %s252_s7 = scalar_lea.vmem %s1020_s2, %s571_s24 }
  0x1c   : > { %v257_v1 = vld [vmem:[%s242_s23] sm:$0xff]  ;;  %v258_v2 = vld [vmem:[%s242_s23 + $0x8] sm:$0xff]  ;;  %v259_v3 = vld [vmem:[%s242_s23 + $0x10] sm:$0xff] }
  0x1d   : > { %v261_v4 = vpack.c.bf16 %v258_v2, %v257_v1  ;;  %v260_v5 = vld [vmem:[%s242_s23 + $0x18] sm:$0xff] }
  0x1e   : > { %v262_v6 = vpack.c.bf16 %v260_v5, %v259_v3 }
  0x1f   : > { %593 = vmatprep.mubr.msk.bf16.mxu0 %vm271_vm0, %v261_v4 }
  0x20   : > { %594 = vmatmul.mubr.msk.bf16.vlgmr.msra.gmra.mrb[0].mxu0 %vm271_vm0, %v262_v6 }
  0xf3   : > { %v595_v7 = vpop.f32.mrb[0].mxu0  ;;  %351 = sbr.rel (%p579_p13) target bundleno = 250 (0xfa), region = 32 }
  0xf4   : > { %v586_v8 = vpack.c.bf16 %v595_v7, %v595_v7  ;;  %v312_v9 = vpop.f32.mrb[1].mxu0 }
  0xf5   : > { %v584_v10 = vpack.c.bf16 %v312_v9, %v312_v9  ;;  %v596_v11 = vpop.f32.mrb[2].mxu0 }
  0xf6   : > { %346 = vst.msk [vmem:[%s252_s7 + $0x8] sm:$0xf] %vm343_vm1, %v586_v8  ;;  %v587_v12 = vpack.c.bf16 %v596_v11, %v596_v11  ;;  %v315_v13 = vpop.f32.mrb[3].mxu0 }
  0xf7   : > { %344 = vst.msk [vmem:[%s252_s7] sm:$0xf] %vm343_vm1, %v584_v10  ;;  %v585_v14 = vpack.c.bf16 %v315_v13, %v315_v13 }
  0xf8   : > { %347 = vst.msk [vmem:[%s252_s7 + $0xc] sm:$0xf] %vm343_vm1, %v587_v12 }
  0xf9   : > { %345 = vst.msk [vmem:[%s252_s7 + $0x4] sm:$0xf] %vm343_vm1, %v585_v14 }
  0xfa PF: > { %vm356_vm3 = vcmask 31744   ;;  %v374_v16 = vmul.f32 %v312_v9, %v312_v9  ;;  %v375_v17 = vmul.f32 %v315_v13, %v315_v13  ;;  %v376_v22 = vmul.f32 %v595_v7, %v595_v7  ;;  %v355_v43 = vld [vmem:[%s915_s8] sm:$0x1]  ;;  %s580_s18 = sshll.u32 %s789_s19, 4  ;;  %s423_s10 = sshll.u32 %s915_s8, 4  ;;  %s933_s10 = int_to_ptr.vmem [resolvable:$true] %s423_s10 }
  0xfb   : > { %v357_v18 = vsel %vm356_vm3, %v312_v9, 0.0  ;;  %v358_v19 = vsel %vm356_vm3, %v315_v13, 0.0  ;;  %v360_v20 = vsel %vm356_vm3, %v595_v7, 0.0  ;;  %v377_v23 = vmul.f32 %v596_v11, %v596_v11  ;;  %v373_v46 = vld [vmem:[%s918_s9] sm:$0x1]  ;;  %s436_s11 = sshll.u32 %s918_s9, 4  ;;  %s931_s14 = scalar_lea.hbm %s1021_s3, %s580_s18  ;;  %s942_s11 = int_to_ptr.vmem [resolvable:$true] %s436_s11 }
  0xfc   : > { %v359_v21 = vadd.f32 %v358_v19, %v357_v18  ;;  %v378_v24 = vsel %vm356_vm3, %v374_v16, 0.0  ;;  %v362_v25 = vsel %vm356_vm3, %v596_v11, 0.0  ;;  %v379_v26 = vsel %vm356_vm3, %v375_v17, 0.0  ;;  %s940_s24 = scalar_lea.hbm %s1022_s4, %s580_s18  ;;  %s401_s29 = scalar_lea.sflag [#allocation3], %s901_s6 }
  0xfd   : > { %v380_v28 = vadd.f32 %v379_v26, %v378_v24  ;;  %v381_v29 = vsel %vm356_vm3, %v376_v22, 0.0  ;;  %v383_v30 = vsel %vm356_vm3, %v377_v23, 0.0  ;;  %vm371_vm4 = vcmask 24576   ;;  %s675_s30 = scalar_lea.vmem %s933_s10, 16  ;;  %s804_s7 = smov [#allocation2]  }
  0xfe   : > { %v361_v27 = vadd.f32 %v360_v20, %v359_v21  ;;  %p676_p0 = scmp.ne.s32.totalorder %s933_s10, %s675_s30  ;;  %s679_s12 = sshll.u32 %s804_s7, 4  ;;  %s680_s12 = int_to_ptr.vmem [resolvable:$false] %s679_s12 }
  0xff   : > { %v382_v32 = vadd.f32 %v381_v29, %v380_v28  ;;  %s681_s13 = scalar_lea.vmem %s680_s12, 32  ;;  %p682_p4 = scmp.lt.s32.totalorder %s933_s10, %s680_s12 }
 0x100   : > { %v363_v31 = vadd.f32 %v362_v25, %v361_v27  ;;  %p677_p1 = pnand %p676_p0, %p880_p3  ;;  %p683_p5 = scmp.lt.s32.totalorder %s681_s13, %s675_s30 }
 0x101   : > { %v384_v34 = vadd.f32 %v383_v30, %v382_v32 }
 0x102   : > { %v364_v33 = vrot.slane %v363_v31, 4  ;;  %p678_p2 = pneg %p677_p1  ;;  %p684_p6 = por %p683_p5, %p682_p4 }
 0x103   : > { %v385_v36 = vrot.slane %v384_v34, 4 }
 0x104   : > { %v365_v35 = vadd.f32 %v364_v33, %v363_v31  ;;  %p685_p7 = pnand %p684_p6, %p678_p2 }
 0x105   : > { %v386_v38 = vadd.f32 %v385_v36, %v384_v34 }
 0x106   : > { %v366_v37 = vrot.slane %v365_v35, 2 }
 0x107   : > { %v387_v40 = vrot.slane %v386_v38, 2 }
 0x108   : > { %v367_v39 = vadd.f32 %v366_v37, %v365_v35 }
 0x109   : > { %v388_v42 = vadd.f32 %v387_v40, %v386_v38 }
 0x10a   : > { %v368_v41 = vrot.slane %v367_v39, 1 }
 0x10b   : > { %v389_v45 = vrot.slane %v388_v42, 1 }
 0x10c   : > { %v369_v44 = vadd.f32 %v368_v41, %v367_v39 }
 0x10d   : > { %v390_v48 = vadd.f32 %v389_v45, %v388_v42 }
 0x10e   : > { %v370_v47 = vadd.f32 %v369_v44, %v355_v43 }
 0x10f   : > { %v391_v49 = vadd.f32 %v390_v48, %v373_v46 }
 0x110   : > { %372 = vst.msk [vmem:[%s915_s8] sm:$0x1] %vm371_vm4, %v370_v47 }
 0x111   : > { %688 = shalt.err (!%p685_p7)
}
 0x112   : > { %s689_s8 = scalar_lea.hbm %s931_s14, 16  ;;  %s693_s23 = scalar_lea.hbm %s1021_s3, 32 }
 0x113   : > { %p690_p8 = scmp.ne.s32.totalorder %s931_s14, %s689_s8  ;;  %p694_p12 = scmp.lt.u32.totalorder %s931_s14, %s1021_s3 }
 0x114   : > { %p695_p13 = scmp.lt.u32.totalorder %s693_s23, %s689_s8  ;;  %p697_p1 = scmp.lt.u32.totalorder %s689_s8, %s931_s14 }
 0x115   : > { %p691_p10 = pnand %p690_p8, %p880_p3 }
 0x116   : > { %p696_p0 = por %p695_p13, %p694_p12 }
 0x117   : > { %p692_p11 = pneg %p691_p10 }
 0x118   : > { %p698_p2 = por %p697_p1, %p696_p0 }
 0x11a   : > { %p699_p4 = pnand %p698_p2, %p692_p11 }
 0x11c   : > { %702 = shalt.err (!%p699_p4)
}
 0x11d   : > { %597 = dma.vmem_to_hbm [thread:$0]  (%p880_p3), %s933_s10, 16, %s931_s14, %s401_s29   ;;  %392 = vst.msk [vmem:[%s918_s9] sm:$0x1] %vm371_vm4, %v391_v49 }
 0x11e   : > { %s405_s30 = scalar_lea.sflag [#allocation5], %s901_s6  ;;  %s703_s13 = scalar_lea.vmem %s942_s11, 16 }
 0x11f   : > { %p704_p5 = scmp.ne.s32.totalorder %s942_s11, %s703_s13  ;;  %s805_s8 = smov [#allocation4]  }
 0x120   : > { %s707_s18 = sshll.u32 %s805_s8, 4  ;;  %s708_s18 = int_to_ptr.vmem [resolvable:$false] %s707_s18 }
 0x121   : > { %p705_p6 = pnand %p704_p5, %p880_p3  ;;  %s709_s19 = scalar_lea.vmem %s708_s18, 32 }
 0x122   : > { %p710_p8 = scmp.lt.s32.totalorder %s942_s11, %s708_s18  ;;  %p711_p10 = scmp.lt.s32.totalorder %s709_s19, %s703_s13 }
 0x123   : > { %p706_p7 = pneg %p705_p6 }
 0x124   : > { %p712_p11 = por %p711_p10, %p710_p8 }
 0x126   : > { %p713_p12 = pnand %p712_p11, %p706_p7 }
 0x128   : > { %716 = shalt.err (!%p713_p12)
}
 0x129   : > { %s717_s6 = scalar_lea.hbm %s940_s24, 16  ;;  %s721_s14 = scalar_lea.hbm %s1022_s4, 32 }
 0x12a   : > { %p718_p13 = scmp.ne.s32.totalorder %s940_s24, %s717_s6  ;;  %p722_p2 = scmp.lt.u32.totalorder %s940_s24, %s1022_s4 }
 0x12b   : > { %p723_p4 = scmp.lt.u32.totalorder %s721_s14, %s717_s6  ;;  %p725_p6 = scmp.lt.u32.totalorder %s717_s6, %s940_s24 }
 0x12c   : > { %p719_p0 = pnand %p718_p13, %p880_p3 }
 0x12d   : > { %p724_p5 = por %p723_p4, %p722_p2 }
 0x12e   : > { %p720_p1 = pneg %p719_p0 }
 0x12f   : > { %p726_p7 = por %p725_p6, %p724_p5 }
 0x131   : > { %p727_p8 = pnand %p726_p7, %p720_p1 }
 0x133   : > { %730 = shalt.err (!%p727_p8)
}
 0x134   : > { %598 = dma.vmem_to_hbm [thread:$0]  (%p880_p3), %s942_s11, 16, %s940_s24, %s405_s30  }
 0x135 PF: > { %p608_p10 = scmp.ge.s32.totalorder %s801_s22, 2  ;;  %s458_s7 = sand.u32 1, %s773_s15  }
 0x136   : > { %s459_s12 = scalar_lea.sflag [#allocation3], %s458_s7 }
 0x137   : > { %p602_p11 = pnand %p608_p10, %p890_p9 }
 0x139   : > { %764 = dma.done.wait (!%p602_p11), %s459_s12, 16  }
 0x13a   : > { %766 = vsyncadd (!%p602_p11), %s459_s12, 4294967280  ;;  %s467_s13 = scalar_lea.sflag [#allocation5], %s458_s7 }
 0x13b   : > { %768 = dma.done.wait (!%p602_p11), %s467_s13, 16  }
 0x13c   : > { %770 = vsyncadd (!%p602_p11), %s467_s13, 4294967280  ;;  %s21_s22 = sadd.s32 1, %s801_s22   ;;  %s1025_s15 = smov %s777_s16 }
 0x13d   : > { %p18_p12 = scmp.ge.s32.totalorder %s21_s22, 6   ;;  %s1026_s16 = smov %s781_s17 }
 0x13e   : > { %s1027_s17 = smov %s898_s5  ;;  %s1028_s18 = smov %s793_s20 }
 0x13f   : > { %s1029_s19 = smov %s797_s21  ;;  %s1030_s20 = smov %s1033_s25 }
 0x140   : > { %s1031_s21 = smov %s1037_s26  ;;  %20 = sbr.rel (!%p18_p12) target bundleno = 7 (0x7), region = 96 }
 0x147   :  { %471 = vsyncpa [#allocation3], 1 }
 0x148   :  { %473 = vsyncpa [#allocation3 + $0x1], 1 }
 0x149   :  { %474 = vsyncpa [#allocation5], 1 }
 0x14a   :  { %476 = vsyncpa [#allocation5 + $0x1], 1 }

</bundles_post_ra>
